<compile_context>
chip_gen: v5e
topology: v5e:2x2
jax: 0.10.0
libtpu: 0.0.40
codegen_flags: <defaults>
</compile_context>

<pallas_src>
import functools

import jax
import jax.numpy as jnp
from jax.experimental import pallas as pl
from jax.experimental.pallas import tpu as pltpu

_MIB = 1024 * 1024


def _round_up(x, m):
    return ((x + m - 1) // m) * m


def _round_down(x, m):
    return (x // m) * m


def _sublane_granule(dtype):
    # sublane packing granule: 8 for 32-bit, 16 for 16-bit, 32 for 8-bit dtypes
    return max(8, 32 // jnp.dtype(dtype).itemsize)


def _tpu_budget():
    """Per-generation (target_block_bytes, vmem_limit_bytes)."""
    try:
        vmem_cap = int(pltpu.get_tpu_info().vmem_capacity_bytes)
    except Exception:
        vmem_cap = 64 * _MIB  # conservative fallback (v7x per-TC physical)
    if vmem_cap >= 100 * _MIB:
        # v5e / v6e: 128 MiB physical; scoped default (16/32 MiB) is too small,
        # raise it explicitly and use ~4 MiB blocks.
        return 4 * _MIB, 64 * _MIB
    # v7x: 64 MiB physical per TC; 4 MiB blocks * 4 buffers = 16 MiB << 32 MiB.
    return 4 * _MIB, 32 * _MIB


def _split_for_cores(tile, extent, n_batch, granule, min_steps=4):
    """Shrink `tile` (kept a multiple of `granule`, or full-extent) so the grid
    has >= min_steps steps when splittable: keeps both v7x TensorCores fed and
    amortizes nothing extra on 1-TC chips (steps stay >= 1 us anyway)."""
    def steps(t):
        return n_batch * (-(-extent // t))
    while steps(tile) < min_steps and tile > granule:
        tile = max(granule, _round_down(tile // 2, granule))
    return tile


def _ln_kernel(x_ref, g_ref, o_ref, *, eps, one_pass):
    # x_ref: (1, C, TR, 128) [packed path] or (1, C, TL) [fallback path]
    # g_ref: (1, C, 1, 1)                  or (1, C, 1)
    # Reduction is always over axis=1 (channels).
    x = x_ref[...].astype(jnp.float32)
    mean = jnp.mean(x, axis=1, keepdims=True)
    if one_pass:
        # single-pass stats for large C: avoids holding (x - mean) live twice
        ex2 = jnp.mean(x * x, axis=1, keepdims=True)
        var = jnp.maximum(ex2 - mean * mean, 0.0)
    else:
        var = jnp.mean(jnp.square(x - mean), axis=1, keepdims=True)
    inv = jax.lax.rsqrt(var + eps)  # EUP rsqrt
    g = g_ref[...].astype(jnp.float32)
    o_ref[...] = ((x - mean) * inv * g).astype(o_ref.dtype)


def layer_norm(x_nchw, g):
    """PyTorch LayerNorm(dim) forward: normalize over channel axis of NCHW."""
    N, C, H, W = x_nchw.shape
    # eps rule matches the PyTorch module spec (dtype-dependent).
    eps = 1e-05 if x_nchw.dtype == jnp.float32 else 1e-03
    L = H * W
    itemsize = jnp.dtype(x_nchw.dtype).itemsize
    sub = _sublane_granule(x_nchw.dtype)
    target_block, vmem_limit = _tpu_budget()
    one_pass = C >= 128

    # TODO(synk): for very large C (block > VMEM budget even at minimum tile),
    # block C with partial-sum accumulation over an extra grid axis.

    if L % 128 == 0:
        # --- sublane-packed path: (N, C, R, 128) free view ---------------
        R = L // 128
        row_bytes = C * 128 * itemsize            # fully packed, no padding
        tr = max(sub, _round_down(target_block // max(1, row_bytes), sub))
        if tr >= R:
            tr = R                                 # full extent is allowed
        tr = _split_for_cores(tr, R, N, granule=sub)
        grid = (N, pl.cdiv(R, tr))
        x_view = x_nchw.reshape(N, C, R, 128)
        g_view = g.reshape(1, C, 1, 1)
        in_specs = [
            pl.BlockSpec((1, C, tr, 128), lambda n, t: (n, 0, t, 0)),
            pl.BlockSpec((1, C, 1, 1), lambda n, t: (0, 0, 0, 0)),   # resident
        ]
        out_spec = pl.BlockSpec((1, C, tr, 128), lambda n, t: (n, 0, t, 0))
        out_shape = jax.ShapeDtypeStruct((N, C, R, 128), x_nchw.dtype)
    else:
        # --- fallback path: (N, C, L), C on sublanes, L on lanes ----------
        # Budget with the *padded* channel count (sublane axis pads to 8/16/32).
        c_pad = _round_up(C, sub)
        tl = max(128, _round_down(target_block // max(1, c_pad * itemsize), 128))
        if tl >= L:
            tl = L                                 # never exceed the array dim
        tl = _split_for_cores(tl, L, N, granule=128)
        grid = (N, pl.cdiv(L, tl))
        x_view = x_nchw.reshape(N, C, L)
        g_view = g.reshape(1, C, 1)
        in_specs = [
            pl.BlockSpec((1, C, tl), lambda n, t: (n, 0, t)),
            pl.BlockSpec((1, C, 1), lambda n, t: (0, 0, 0)),         # resident
        ]
        out_spec = pl.BlockSpec((1, C, tl), lambda n, t: (n, 0, t))
        out_shape = jax.ShapeDtypeStruct((N, C, L), x_nchw.dtype)

    out = pl.pallas_call(
        functools.partial(_ln_kernel, eps=eps, one_pass=one_pass),
        out_shape=out_shape,
        grid_spec=pl.GridSpec(grid=grid, in_specs=in_specs, out_specs=out_spec),
        compiler_params=pltpu.CompilerParams(
            # both axes independent -> feeds both TensorCores on v7x
            dimension_semantics=("parallel", "parallel"),
            vmem_limit_bytes=vmem_limit,
        ),
    )(x_view, g_view)

    return out.reshape(N, C, H, W)


def _ref_layer_norm(x, g):
    eps = 1e-05 if x.dtype == jnp.float32 else 1e-03
    mean = jnp.mean(x, axis=1, keepdims=True)
    var = jnp.mean((x - mean) ** 2, axis=1, keepdims=True)
    return (x - mean) * jax.lax.rsqrt(var + eps) * g


if __name__ == "__main__":
    key = jax.random.PRNGKey(0)

    # Main case (packed path: L = 256 is a multiple of 128).
    N, C, H, W = 2, 4, 16, 16
    x = jax.random.normal(key, (N, C, H, W), dtype=jnp.float32)
    g = jnp.ones((1, C, 1, 1), dtype=jnp.float32)  # nn.Parameter(torch.ones(1,dim,1,1))
    y = jax.block_until_ready(layer_norm(x, g))
    assert y.shape == (N, C, H, W)
    assert jnp.allclose(y, _ref_layer_norm(x, g), atol=1e-5, rtol=1e-5)

    # Fallback case (L = 36, not a multiple of 128).
    key2 = jax.random.PRNGKey(1)
    x2 = jax.random.normal(key2, (2, 4, 6, 6), dtype=jnp.float32)
    g2 = jnp.ones((1, 4, 1, 1), dtype=jnp.float32)
    y2 = jax.block_until_ready(layer_norm(x2, g2))
    assert jnp.allclose(y2, _ref_layer_norm(x2, g2), atol=1e-5, rtol=1e-5)

    print("KERNEL_OK")
</pallas_src>

<mosaic_0001>
module attributes {stable_mosaic.version = 11 : i64} {
  func.func @_ln_kernel(%arg0: i32, %arg1: i32, %arg2: memref<1x4x2x128xf32, #tpu.memory_space<vmem>>, %arg3: memref<1x4x1x1xf32, #tpu.memory_space<vmem>>, %arg4: memref<1x4x2x128xf32, #tpu.memory_space<vmem>>) attributes {dimension_semantics = [#tpu.dimension_semantics<parallel>, #tpu.dimension_semantics<parallel>], iteration_bounds = array<i64: 2, 1>, scalar_prefetch = 0 : i64, scratch_operands = 0 : i64, tpu.core_type = #tpu.core_type<tc>, window_params = [{transform_indices = @transform_0, window_bounds = array<i64: 1, 4, 2, 128>}, {pipeline_mode = #tpu.pipeline_mode<synchronous>, transform_indices = @transform_1, window_bounds = array<i64: 1, 4, 1, 1>}, {transform_indices = @transform_2, window_bounds = array<i64: 1, 4, 2, 128>}]} {
    %c0 = arith.constant 0 : index
    %c0_0 = arith.constant 0 : index
    %c0_1 = arith.constant 0 : index
    %c0_2 = arith.constant 0 : index
    %0 = vector.load %arg2[%c0, %c0_0, %c0_1, %c0_2] : memref<1x4x2x128xf32, #tpu.memory_space<vmem>>, vector<1x4x2x128xf32>
    %cst = arith.constant dense<0.000000e+00> : vector<1x2x128xf32>
    %1 = vector.multi_reduction <add>, %0, %cst [1] : vector<1x4x2x128xf32> to vector<1x2x128xf32>
    %2 = vector.shape_cast %1 : vector<1x2x128xf32> to vector<1x1x2x128xf32>
    %cst_3 = arith.constant 4.000000e+00 : f32
    %3 = vector.broadcast %cst_3 : f32 to vector<1x1x2x128xf32>
    %4 = arith.divf %2, %3 : vector<1x1x2x128xf32>
    %5 = vector.broadcast %4 : vector<1x1x2x128xf32> to vector<1x4x2x128xf32>
    %6 = arith.subf %0, %5 : vector<1x4x2x128xf32>
    %7 = arith.mulf %6, %6 : vector<1x4x2x128xf32>
    %cst_4 = arith.constant dense<0.000000e+00> : vector<1x2x128xf32>
    %8 = vector.multi_reduction <add>, %7, %cst_4 [1] : vector<1x4x2x128xf32> to vector<1x2x128xf32>
    %9 = vector.shape_cast %8 : vector<1x2x128xf32> to vector<1x1x2x128xf32>
    %cst_5 = arith.constant 4.000000e+00 : f32
    %10 = vector.broadcast %cst_5 : f32 to vector<1x1x2x128xf32>
    %11 = arith.divf %9, %10 : vector<1x1x2x128xf32>
    %cst_6 = arith.constant 9.99999974E-6 : f32
    %12 = vector.broadcast %cst_6 : f32 to vector<1x1x2x128xf32>
    %13 = arith.addf %11, %12 : vector<1x1x2x128xf32>
    %14 = math.rsqrt %13 : vector<1x1x2x128xf32>
    %c0_7 = arith.constant 0 : index
    %c0_8 = arith.constant 0 : index
    %c0_9 = arith.constant 0 : index
    %c0_10 = arith.constant 0 : index
    %15 = vector.load %arg3[%c0_7, %c0_8, %c0_9, %c0_10] : memref<1x4x1x1xf32, #tpu.memory_space<vmem>>, vector<1x4x1x1xf32>
    %16 = vector.broadcast %4 : vector<1x1x2x128xf32> to vector<1x4x2x128xf32>
    %17 = arith.subf %0, %16 : vector<1x4x2x128xf32>
    %18 = vector.broadcast %14 : vector<1x1x2x128xf32> to vector<1x4x2x128xf32>
    %19 = arith.mulf %17, %18 : vector<1x4x2x128xf32>
    %20 = vector.broadcast %15 : vector<1x4x1x1xf32> to vector<1x4x2x128xf32>
    %21 = arith.mulf %19, %20 : vector<1x4x2x128xf32>
    %c0_11 = arith.constant 0 : index
    %c0_12 = arith.constant 0 : index
    %c0_13 = arith.constant 0 : index
    %c0_14 = arith.constant 0 : index
    %22 = vector.load %arg4[%c0_11, %c0_12, %c0_13, %c0_14] : memref<1x4x2x128xf32, #tpu.memory_space<vmem>>, vector<1x4x2x128xf32>
    tpu.vector_store %arg4[%c0_11, %c0_12, %c0_13, %c0_14], %21 {strides = array<i32>} : memref<1x4x2x128xf32, #tpu.memory_space<vmem>>, vector<1x4x2x128xf32>,
    return
  }
  func.func @transform_0(%arg0: i32, %arg1: i32) -> (i32, i32, i32, i32) {
    %c0_i32 = arith.constant 0 : i32
    %c0_i32_0 = arith.constant 0 : i32
    %c0_i32_1 = arith.constant 0 : i32
    return %arg0, %c0_i32, %arg1, %c0_i32_0 : i32, i32, i32, i32
  }
  func.func @transform_1(%arg0: i32, %arg1: i32) -> (i32, i32, i32, i32) {
    %c0_i32 = arith.constant 0 : i32
    %c0_i32_0 = arith.constant 0 : i32
    %c0_i32_1 = arith.constant 0 : i32
    %c0_i32_2 = arith.constant 0 : i32
    %c0_i32_3 = arith.constant 0 : i32
    return %c0_i32, %c0_i32_0, %c0_i32_1, %c0_i32_2 : i32, i32, i32, i32
  }
  func.func @transform_2(%arg0: i32, %arg1: i32) -> (i32, i32, i32, i32) {
    %c0_i32 = arith.constant 0 : i32
    %c0_i32_0 = arith.constant 0 : i32
    %c0_i32_1 = arith.constant 0 : i32
    return %arg0, %c0_i32, %arg1, %c0_i32_0 : i32, i32, i32, i32
  }
}

</mosaic_0001>

<bundles_post_ra>
// kernel: tpu_custom_call.1
= control target key start
LH: loop header
LB: loop body
LE: loop exit
PB: predicated region body
PF: predicated region fallthrough
CT: control target
= control target key end

     0   :  { %7 = vsyncpa [#allocation3], 0  ;;  %s744_s0 = inlined_call_operand.hbm [shape: f32[2,4,2,128], index: 0, kind: input, shape index: {}]   ;;  %s745_s1 = inlined_call_operand.vmem [shape: f32[1,4,1,1], index: 1, kind: input, shape index: {}]   ;;  %s746_s2 = inlined_call_operand.hbm [shape: f32[2,4,2,128], index: 2, kind: output, shape index: {}]  }
   0x1   :  { %9 = vsyncpa [#allocation3 + $0x1], 0 }
   0x2   :  { %10 = vsyncpa [#allocation4], 0 }
   0x3   :  { %12 = vsyncpa [#allocation4 + $0x1], 0  ;;  %s600_s9 = smov 0   ;;  %s602_s10 = smov 0  }
   0x4   :  { %s604_s11 = smov 0   ;;  %s606_s12 = smov 0  }
   0x5   :  { %s608_s13 = smov 0   ;;  %s610_s14 = smov 0  }
   0x6 LB: > { %s370_s15 = sadd.s32 4294967295, %s577_s14   ;;  %s371_s16 = sadd.s32 4294967294, %s577_s14   ;;  %s577_s14 = sphi %s610_s14, %s18_s14   ;;  %s573_s13 = sphi %s608_s13, %s755_s13   ;;  %s569_s12 = sphi %s606_s12, %s754_s12   ;;  %s565_s11 = sphi %s604_s11, %s753_s11   ;;  %s561_s10 = sphi %s602_s10, %s752_s10   ;;  %s557_s9 = sphi %s600_s9, %s751_s9  }
   0x7   : > { %s30_s17 = sadd.s32 1, %s573_s13  ;;  %s39_s18 = sadd.s32 1, %s565_s11 }
   0x8   : > { %p32_p0 = scmp.ge.s32.totalorder %s30_s17, 2  ;;  %p46_p1 = scmp.ne.s32.totalorder %s565_s11, %s561_s10 }
   0x9   : > { %p47_p2 = scmp.eq.s32.totalorder %s577_s14, 0  ;;  %p52_p3 = scmp.ne.s32.totalorder %s561_s10, %s557_s9 }
   0xa   : > { %s757_s17 = smov (%p32_p0, %s30_s17), 0  ;;  %p53_p5 = scmp.eq.s32.totalorder %s370_s15, 0 }
   0xb   : > { %p641_p4 = por %p47_p2, %p46_p1  ;;  %s34_s20 = ssub.s32 %s573_s13, %s757_s17 }
   0xc   : > { %p99_p6 = scmp.eq.s32.totalorder %s370_s15, 1  ;;  %p37_p7 = scmp.eq.s32.totalorder %s34_s20, 0 }
   0xd   : > { %p647_p8 = por %p53_p5, %p52_p3  ;;  %p105_p10 = scmp.eq.s32.totalorder %s371_s16, 1 }
   0xe   : > { %p651_p9 = por %p99_p6, %p46_p1  ;;  %p373_p12 = scmp.ge.s32.totalorder %s577_s14, 2 }
   0xf   : > { %s656_s23 = scalar_select %p37_p7, %s565_s11, %s39_s18  }
  0x10   : > { %p658_p11 = por %p105_p10, %p52_p3  ;;  %p399_p13 = scmp.lt.s32.totalorder %s577_s14, 2 }
  0x11   : > { %s128_s25 = sand.u32 1, %s565_s11   ;;  %s385_s27 = sshll.u32 %s573_s13, 3 }
  0x12   : > { %s374_s26 = sshll.u32 %s128_s25, 3  ;;  %s138_s30 = scalar_lea.hbm %s744_s0, %s385_s27 }
  0x13   : > { %s132_s3 = scalar_lea.vmem [#allocation2], %s374_s26  ;;  %s139_s5 = sshll.u32 %s138_s30, 4  ;;  %s140_s5 = int_to_ptr.hbm [resolvable:$true] %s139_s5 }
  0x14   : > { %s141_s4 = sshll.u32 %s132_s3, 4  ;;  %p392_p0 = pnand %p399_p13, %p641_p4  ;;  %s142_s4 = int_to_ptr.vmem [resolvable:$true] %s141_s4 }
  0x15   : > { %p377_p1 = scmp.ge.s32.totalorder %s577_s14, 1  ;;  %s129_s6 = scalar_lea.sflag [#allocation3], %s128_s25 }
  0x16   : > { %s579_s7 = smov 32   ;;  %s580_s8 = smov 2  }
  0x17   : > { %394 = dma.hbm_to_vmem [thread:$0]  (!%p392_p0), %s140_s5, 128, %s142_s4, %s129_s6, %s579_s7, %s579_s7, %s580_s8  }
  0x18   : > { %p149_p2 = scmp.lt.s32.totalorder %s577_s14, 3 }
  0x1a   : > { %p150_p3 = pnand %p377_p1, %p149_p2 }
  0x1b   : > { %s674_s15 = sand.u32 (!%p150_p3), 1, %s561_s10  }
  0x1c   : > { %153 = sbr.rel (%p150_p3) target bundleno = 166 (0xa6), region = 28  ;;  %s378_s16 = sshll.u32 (!%p150_p3), %s674_s15, 3 }
  0x1d   : > { %s156_s18 = scalar_lea.sflag (!%p150_p3), [#allocation3], %s674_s15  ;;  %s159_s19 = scalar_lea.vmem (!%p150_p3), [#allocation2], %s378_s16 }
  0x21   : > { %548 = dma.done.wait (%p647_p8), %s156_s18, 128  }
  0x22   : > { %550 = vsyncadd (%p647_p8), %s156_s18, 4294967168  ;;  %v581_v0 = vmov 0   ;;  %v457_v1 = vld [vmem:[%s745_s1 + $0x2] ss:$0 sm:$0xff]  ;;  %v458_v2 = vld [vmem:[%s745_s1] ss:$0 sm:$0xff] }
  0x23   : > { %456 = vset.pattern.permute.xlu1 %v581_v0  ;;  %455 = vset.pattern.permute.xlu0 %v581_v0  ;;  %v459_v3 = vld [vmem:[%s745_s1 + $0x3] ss:$0 sm:$0xff]  ;;  %v460_v4 = vld [vmem:[%s745_s1 + $0x1] ss:$0 sm:$0xff]  ;;  %v582_v5 = vmov 4.0   ;;  %vm185_vm0 = vcmask 1041408  }
  0x24   : > { %253 = vperm.xlu1 %456, %v457_v1   ;;  %245 = vperm.xlu0 %455, %v458_v2   ;;  %461 = vrcp.f32 %v582_v5  ;;  %v181_v10 = vld [vmem:[%s159_s19] sm:$0x3]  ;;  %v182_v11 = vld [vmem:[%s159_s19 + $0x2] sm:$0x3]  ;;  %v183_v15 = vld [vmem:[%s159_s19 + $0x4] sm:$0x3] }
  0x25   : > { %v186_v13 = vsel %vm185_vm0, %v181_v10, 0.0  ;;  %v187_v14 = vsel %vm185_vm0, %v182_v11, 0.0  ;;  %v189_v17 = vsel %vm185_vm0, %v183_v15, 0.0  ;;  %v184_v18 = vld [vmem:[%s159_s19 + $0x6] sm:$0x3]  ;;  %s386_s3 = sshll.u32 %s569_s12, 3 }
  0x26   : > { %v188_v16 = vadd.f32 %v187_v14, %v186_v13  ;;  %v191_v21 = vsel %vm185_vm0, %v184_v18, 0.0  ;;  %s180_s4 = scalar_lea.vmem [#allocation5], %s378_s16  ;;  %s281_s7 = scalar_lea.hbm %s746_s2, %s386_s3 }
  0x27   : > { %s282_s8 = sshll.u32 %s180_s4, 4  ;;  %s284_s18 = sshll.u32 %s281_s7, 4  ;;  %s283_s8 = int_to_ptr.vmem [resolvable:$true] %s282_s8  ;;  %s285_s18 = int_to_ptr.hbm [resolvable:$true] %s284_s18 }
  0x28   : > { %v190_v19 = vadd.f32 %v189_v17, %v188_v16  ;;  %s269_s12 = scalar_lea.sflag [#allocation4], %s674_s15  ;;  %s509_s16 = sshra.s32 %s285_s18, 4  ;;  %s510_s16 = int_to_ptr.hbm [resolvable:$true] %s509_s16 }
  0x29   : > { %s511_s19 = scalar_lea.hbm %s510_s16, 8  ;;  %s515_s26 = scalar_lea.hbm %s746_s2, 16 }
  0x2a   : > { %v462_v6 = vpop.eup %461  ;;  %v192_v22 = vadd.f32 %v191_v21, %v190_v19  ;;  %p512_p4 = scmp.ne.s32.totalorder %s510_s16, %s511_s19  ;;  %p516_p7 = scmp.lt.s32.totalorder %s510_s16, %s746_s2 }
  0x2b   : > { %v194_v7 = vmul.f32 4.0, %v462_v6  ;;  %vm198_vm1 = vweird.f32 %v462_v6  ;;  %p517_p8 = scmp.lt.s32.totalorder %s515_s26, %s511_s19 }
  0x2c   : > { %257 = vperm.xlu1 %456, %v459_v3   ;;  %249 = vperm.xlu0 %455, %v460_v4   ;;  %p513_p5 = pnand %p512_p4, %p651_p9 }
  0x2d   : > { %v195_v8 = vsub.f32 1.0, %v194_v7  ;;  %p518_p10 = por %p517_p8, %p516_p7 }
  0x2e   : > { %p514_p6 = pneg %p513_p5 }
  0x2f   : > { %v196_v9 = vmul.f32 %v462_v6, %v195_v8 }
  0x30   : > { %p519_p13 = pnand %p518_p10, %p514_p6 }
  0x31   : > { %v197_v12 = vadd.f32 %v462_v6, %v196_v9 }
  0x33   : > { %v199_v20 = vsel %vm198_vm1, %v462_v6, %v197_v12 }
  0x34   : > { %v200_v23 = vmul.f32 %v199_v20, %v192_v22 }
  0x36   : > { %v201_v24 = vsub.f32 %v181_v10, %v200_v23  ;;  %v202_v25 = vsub.f32 %v182_v11, %v200_v23  ;;  %v203_v26 = vsub.f32 %v183_v15, %v200_v23  ;;  %v204_v29 = vsub.f32 %v184_v18, %v200_v23 }
  0x38   : > { %v205_v27 = vmul.f32 %v201_v24, %v201_v24  ;;  %v206_v28 = vmul.f32 %v202_v25, %v202_v25  ;;  %v207_v30 = vmul.f32 %v203_v26, %v203_v26  ;;  %v208_v34 = vmul.f32 %v204_v29, %v204_v29 }
  0x3a   : > { %v209_v31 = vsel %vm185_vm0, %v205_v27, 0.0  ;;  %v210_v32 = vsel %vm185_vm0, %v206_v28, 0.0  ;;  %v212_v35 = vsel %vm185_vm0, %v207_v30, 0.0  ;;  %v214_v37 = vsel %vm185_vm0, %v208_v34, 0.0 }
  0x3b   : > { %v211_v33 = vadd.f32 %v210_v32, %v209_v31 }
  0x3d   : > { %v213_v36 = vadd.f32 %v212_v35, %v211_v33 }
  0x3f   : > { %v215_v38 = vadd.f32 %v214_v37, %v213_v36 }
  0x41   : > { %v216_v39 = vmul.f32 %v215_v38, %v199_v20 }
  0x43   : > { %v217_v40 = vadd.f32 1e-05, %v216_v39 }
  0x45   : > { %463 = vrsqrt.f32 %v217_v40  ;;  %vm224_vm2 = vweird.f32 %v217_v40 }
  0x4b   : > { %v464_v41 = vpop.eup %463 }
  0x4c   : > { %v219_v42 = vmul.f32 %v464_v41, %v217_v40  ;;  %vm225_vm3 = vweird.f32 %v464_v41 }
  0x4d   : > { %vm226_vm4 = vmor %vm224_vm2, %vm225_vm3 }
  0x4e   : > { %v220_v43 = vmul.f32 %v464_v41, %v219_v42 }
  0x50   : > { %v221_v44 = vmul.f32 0.5, %v220_v43 }
  0x52   : > { %v222_v45 = vsub.f32 1.5, %v221_v44 }
  0x54   : > { %v223_v46 = vmul.f32 %v464_v41, %v222_v45 }
  0x56   : > { %v227_v47 = vsel %vm226_vm4, %v464_v41, %v223_v46 }
  0x57   : > { %v234_v48 = vmul.f32 %v227_v47, %v203_v26  ;;  %v232_v49 = vmul.f32 %v227_v47, %v201_v24  ;;  %v235_v54 = vmul.f32 %v227_v47, %v204_v29  ;;  %v233_v55 = vmul.f32 %v227_v47, %v202_v25 }
  0x96   : > { %v254_v50 = vpop.permute.xlu1 %253  ;;  %v246_v52 = vpop.permute.xlu0 %245 }
  0x97   : > { %v262_v51 = vmul.f32 %v254_v50, %v234_v48  ;;  %v260_v53 = vmul.f32 %v246_v52, %v232_v49 }
  0x99   : > { %266 = vst [vmem:[%s180_s4 + $0x4] sm:$0x3] %v262_v51 }
  0x9a   : > { %264 = vst [vmem:[%s180_s4] sm:$0x3] %v260_v53 }
  0x9e   : > { %v258_v56 = vpop.permute.xlu1 %257  ;;  %v250_v58 = vpop.permute.xlu0 %249 }
  0x9f   : > { %v263_v57 = vmul.f32 %v258_v56, %v235_v54  ;;  %v261_v59 = vmul.f32 %v250_v58, %v233_v55 }
  0xa1   : > { %267 = vst [vmem:[%s180_s4 + $0x6] sm:$0x3] %v263_v57 }
  0xa2   : > { %265 = vst [vmem:[%s180_s4 + $0x2] sm:$0x3] %v261_v59 }
  0xa3   : > { %522 = shalt.err (!%p519_p13)
}
  0xa4   : > { %s583_s15 = smov 32   ;;  %s584_s29 = smov 2  }
  0xa5   : > { %389 = dma.vmem_to_hbm [thread:$0]  (%p651_p9), %s283_s8, 128, %s285_s18, %s269_s12, %s583_s15, %s583_s15, %s584_s29  }
  0xa6 PF: > { %s299_s30 = sand.u32 1, %s557_s9   ;;  %p396_p0 = pnand %p373_p12, %p658_p11 }
  0xa7   : > { %s300_s21 = scalar_lea.sflag [#allocation4], %s299_s30 }
  0xa8   : > { %p397_p1 = pneg %p396_p0 }
  0xaa   : > { %552 = dma.done.wait (%p397_p1), %s300_s21, 128  }
  0xab   : > { %554 = vsyncadd (%p397_p1), %s300_s21, 4294967168  ;;  %s18_s14 = sadd.s32 1, %s577_s14   ;;  %s751_s9 = smov %s561_s10 }
  0xac   : > { %p15_p2 = scmp.ge.s32.totalorder %s18_s14, 4   ;;  %s752_s10 = smov %s565_s11 }
  0xad   : > { %s753_s11 = smov %s656_s23  ;;  %s754_s12 = smov %s573_s13 }
  0xae   : > { %s755_s13 = smov %s757_s17  ;;  %17 = sbr.rel (!%p15_p2) target bundleno = 6 (0x6), region = 73 }
  0xb3   :  { %306 = vsyncpa [#allocation3], 1 }
  0xb4   :  { %308 = vsyncpa [#allocation3 + $0x1], 1 }
  0xb5   :  { %309 = vsyncpa [#allocation4], 1 }
  0xb6   :  { %311 = vsyncpa [#allocation4 + $0x1], 1 }

</bundles_post_ra>
